<compile_context>
chip_gen: v7x
topology: tpu7x:2x2x1
jax: 0.10.0
libtpu: 0.0.40
codegen_flags: <defaults>
</compile_context>

<pallas_src>
import jax
import jax.numpy as jnp
from jax.experimental import pallas as pl
from jax.experimental.pallas import tpu as pltpu


def _matching_kernel(h1_ref, ctx_ref, w1_ref, b1_ref, w2_ref, b2_ref, out_ref):
    # Streamed activations arrive as bf16; do all VPU math in f32.
    h1 = h1_ref[...].astype(jnp.float32)      # [TB, H]
    ctx = ctx_ref[...].astype(jnp.float32)    # [TB, H]

    # args.mat_norm: x = x / (||x||_2 + 1e-6), norm over the feature dim.
    # Divides -> approximate EUP reciprocals (EUP slot is otherwise idle here).
    h1_norm = jnp.sqrt(jnp.sum(h1 * h1, axis=-1, keepdims=True))     # [TB, 1]
    ctx_norm = jnp.sqrt(jnp.sum(ctx * ctx, axis=-1, keepdims=True))  # [TB, 1]
    h1 = h1 * pl.reciprocal(h1_norm + 1e-6, approx=True)
    ctx = ctx * pl.reciprocal(ctx_norm + 1e-6, approx=True)

    # args.mat_mul: elementwise product; cast to bf16 so the MXU runs in native bf16 mode.
    h = (h1 * ctx).astype(jnp.bfloat16)        # [TB, H]

    # fc1: Linear(H, H) on the MXU (bf16 x bf16 -> f32 accumulate); bias + LeakyReLU in f32.
    z1 = jnp.dot(h, w1_ref[...], preferred_element_type=jnp.float32) + b1_ref[...]
    # LeakyReLU, default negative_slope = 0.01.
    z1 = jnp.where(z1 > 0, z1, 0.01 * z1)      # [TB, H]

    # fc2: Linear(H, 1) as w2 [1,H] x z1^T [H,TB] on the (otherwise idle) MXU.
    # Result is already lane-dense [1, TB]: no XLU lane-reduce, no sublane->lane relayout.
    z2 = pl.dot(w2_ref[...], z1, trans_b=True)  # [1, TB], f32
    z2 = z2 + b2_ref[0, 0]

    # Sigmoid via a single EUP tanh: sigmoid(x) = 0.5 * (tanh(x/2) + 1).
    out_ref[...] = (0.5 * (jnp.tanh(0.5 * z2) + 1.0)).astype(out_ref.dtype)


def matching_network_forward(h1, ctx, w1_t, b1, w2_row, b2, *, tb=1024):
    """MatchingNetwork forward (mat_norm=True, mat_mul=True).

    h1, ctx : [B, H] activations (any float dtype; streamed to the kernel as bf16)
    w1_t    : [H, H] fc1 weight laid out (in, out), i.e. torch fc1.weight.T
    b1      : [1, H] fc1 bias
    w2_row  : [1, H] fc2 weight as a row (torch fc2.weight)
    b2      : [1, 1] fc2 bias
    returns : [B, 1] float32 matching scores

    Batch all (timestep x candidate) rows into one call to amortize fixed overhead.
    Tuning: on v5e/v6e (single TensorCore) the default large tb (one or few tiles) is
    best; on v7x pass a tb such that ceil(B/tb) >= 2 so both TensorCores get tiles,
    and keep 2*2*tb*H*2B (double-buffered bf16 streams) well under the 64 MiB VMEM.
    """
    B, H = h1.shape

    # bf16 streaming for the two big inputs and the resident fc1 weight (no-op if the
    # caller already produces bf16).  Bias / fc2 weight / output stay f32.
    h1 = h1.astype(jnp.bfloat16)
    ctx = ctx.astype(jnp.bfloat16)
    w1_t = w1_t.astype(jnp.bfloat16)
    b1 = b1.astype(jnp.float32)
    w2_row = w2_row.astype(jnp.float32)
    b2 = b2.astype(jnp.float32)

    # Tile choice: a single full-batch block if it fits the tile budget, otherwise
    # tb-row tiles with a ragged (masked) last tile.  No jnp.pad / extra HBM copies.
    if B <= tb:
        tb_eff, grid = B, 1
    else:
        assert tb % 128 == 0, "tb must be a multiple of 128 when tiling the batch"
        tb_eff, grid = tb, pl.cdiv(B, tb)

    out = pl.pallas_call(
        _matching_kernel,
        out_shape=jax.ShapeDtypeStruct((1, B), jnp.float32),
        grid=(grid,),
        in_specs=[
            pl.BlockSpec((tb_eff, H), lambda i: (i, 0)),        # h1 tile (streamed, bf16)
            pl.BlockSpec((tb_eff, H), lambda i: (i, 0)),        # ctx tile (streamed, bf16)
            pl.BlockSpec((H, H), lambda i: (0, 0)),             # w1: VMEM-resident (bf16)
            pl.BlockSpec((1, H), lambda i: (0, 0)),             # b1: VMEM-resident
            pl.BlockSpec((1, H), lambda i: (0, 0)),             # w2 row: VMEM-resident
            pl.BlockSpec(memory_space=pltpu.MemorySpace.SMEM),  # b2 scalar in SMEM
        ],
        out_specs=pl.BlockSpec((1, tb_eff), lambda i: (0, i)),  # lane-dense (1, B) slab
        compiler_params=pltpu.CompilerParams(
            # Shards batch tiles across v7x's 2 TensorCores; harmless on v5e/v6e.
            dimension_semantics=("parallel",),
            # Tiles at the default tb fit comfortably in every generation's scoped VMEM;
            # raise vmem_limit_bytes only if tb*H is pushed far beyond the defaults here.
        ),
    )(h1, ctx, w1_t, b1, w2_row, b2)

    return out[0, :].reshape(B, 1)


def _reference(h1, ctx, w1_t, b1, w2_row, b2):
    h1 = h1 / (jnp.linalg.norm(h1, axis=1, keepdims=True) + 1e-6)
    ctx = ctx / (jnp.linalg.norm(ctx, axis=1, keepdims=True) + 1e-6)
    h = h1 * ctx
    z1 = h @ w1_t + b1
    z1 = jnp.where(z1 > 0, z1, 0.01 * z1)
    z2 = z1 @ w2_row.T + b2
    return jax.nn.sigmoid(z2)


if __name__ == "__main__":
    # Small shapes: H = args.rnn_dim; B = batched (timestep x candidate) rows.
    # B=192 with tb=128 exercises the multi-tile grid plus the ragged last tile.
    B, H = 192, 128
    key = jax.random.PRNGKey(0)
    k_h1, k_ctx, k_w1, k_b1, k_w2, k_b2 = jax.random.split(key, 6)

    h1 = jax.random.normal(k_h1, (B, H), dtype=jnp.float32)
    ctx = jax.random.normal(k_ctx, (B, H), dtype=jnp.float32)

    # Deterministic param init mimicking nn.Linear uniform(-1/sqrt(fan_in), 1/sqrt(fan_in)).
    bound = 1.0 / jnp.sqrt(float(H))
    w1_t = jax.random.uniform(k_w1, (H, H), minval=-bound, maxval=bound, dtype=jnp.float32)
    b1 = jax.random.uniform(k_b1, (1, H), minval=-bound, maxval=bound, dtype=jnp.float32)
    w2_row = jax.random.uniform(k_w2, (1, H), minval=-bound, maxval=bound, dtype=jnp.float32)
    b2 = jax.random.uniform(k_b2, (1, 1), minval=-bound, maxval=bound, dtype=jnp.float32)

    out = matching_network_forward(h1, ctx, w1_t, b1, w2_row, b2, tb=128)
    out = jax.block_until_ready(out)

    ref = _reference(h1, ctx, w1_t, b1, w2_row, b2)
    assert out.shape == (B, 1)
    max_err = float(jnp.max(jnp.abs(out - ref)))
    # Tolerance covers bf16 input streaming + approx EUP reciprocals for the norms
    # (measured error is far below this; NaNs would also fail this check).
    assert max_err < 5e-3, f"mismatch vs JAX reference, max abs err = {max_err}"

    print("KERNEL_OK")
</pallas_src>

<mosaic_0001>
module attributes {stable_mosaic.version = 11 : i64} {
  func.func @_matching_kernel(%arg0: i32, %arg1: memref<128x128xbf16, #tpu.memory_space<vmem>>, %arg2: memref<128x128xbf16, #tpu.memory_space<vmem>>, %arg3: memref<128x128xbf16, #tpu.memory_space<vmem>>, %arg4: memref<1x128xf32, #tpu.memory_space<vmem>>, %arg5: memref<1x128xf32, #tpu.memory_space<vmem>>, %arg6: memref<1x1xf32, #tpu.memory_space<smem>>, %arg7: memref<1x128xf32, #tpu.memory_space<vmem>>) attributes {dimension_semantics = [#tpu.dimension_semantics<parallel>], iteration_bounds = array<i64: 2>, scalar_prefetch = 0 : i64, scratch_operands = 0 : i64, tpu.core_type = #tpu.core_type<tc>, window_params = [{transform_indices = @transform_0, window_bounds = array<i64: 128, 128>}, {transform_indices = @transform_1, window_bounds = array<i64: 128, 128>}, {pipeline_mode = #tpu.pipeline_mode<synchronous>, transform_indices = @transform_2, window_bounds = array<i64: 128, 128>}, {pipeline_mode = #tpu.pipeline_mode<synchronous>, transform_indices = @transform_3, window_bounds = array<i64: 1, 128>}, {pipeline_mode = #tpu.pipeline_mode<synchronous>, transform_indices = @transform_4, window_bounds = array<i64: 1, 128>}, {transform_indices = @transform_5, window_bounds = array<i64: 1, 1>}, {transform_indices = @transform_6, window_bounds = array<i64: 1, 128>}]} {
    %c0 = arith.constant 0 : index
    %c0_0 = arith.constant 0 : index
    %0 = vector.load %arg1[%c0, %c0_0] : memref<128x128xbf16, #tpu.memory_space<vmem>>, vector<128x128xbf16>
    %1 = arith.extf %0 : vector<128x128xbf16> to vector<128x128xf32>
    %c0_1 = arith.constant 0 : index
    %c0_2 = arith.constant 0 : index
    %2 = vector.load %arg2[%c0_1, %c0_2] : memref<128x128xbf16, #tpu.memory_space<vmem>>, vector<128x128xbf16>
    %3 = arith.extf %2 : vector<128x128xbf16> to vector<128x128xf32>
    %4 = arith.mulf %1, %1 : vector<128x128xf32>
    %cst = arith.constant dense<0.000000e+00> : vector<128xf32>
    %5 = vector.multi_reduction <add>, %4, %cst [1] : vector<128x128xf32> to vector<128xf32>
    %6 = vector.shape_cast %5 : vector<128xf32> to vector<128x1xf32>
    %7 = math.sqrt %6 : vector<128x1xf32>
    %8 = arith.mulf %3, %3 : vector<128x128xf32>
    %cst_3 = arith.constant dense<0.000000e+00> : vector<128xf32>
    %9 = vector.multi_reduction <add>, %8, %cst_3 [1] : vector<128x128xf32> to vector<128xf32>
    %10 = vector.shape_cast %9 : vector<128xf32> to vector<128x1xf32>
    %11 = math.sqrt %10 : vector<128x1xf32>
    %cst_4 = arith.constant 9.99999997E-7 : f32
    %12 = vector.broadcast %cst_4 : f32 to vector<128x1xf32>
    %13 = arith.addf %7, %12 : vector<128x1xf32>
    %14 = tpu.reciprocal %13 {approx = true} : vector<128x1xf32> -> vector<128x1xf32>
    %15 = vector.broadcast %14 : vector<128x1xf32> to vector<128x128xf32>
    %16 = arith.mulf %1, %15 : vector<128x128xf32>
    %cst_5 = arith.constant 9.99999997E-7 : f32
    %17 = vector.broadcast %cst_5 : f32 to vector<128x1xf32>
    %18 = arith.addf %11, %17 : vector<128x1xf32>
    %19 = tpu.reciprocal %18 {approx = true} : vector<128x1xf32> -> vector<128x1xf32>
    %20 = vector.broadcast %19 : vector<128x1xf32> to vector<128x128xf32>
    %21 = arith.mulf %3, %20 : vector<128x128xf32>
    %22 = arith.mulf %16, %21 : vector<128x128xf32>
    %23 = arith.truncf %22 : vector<128x128xf32> to vector<128x128xbf16>
    %c0_6 = arith.constant 0 : index
    %c0_7 = arith.constant 0 : index
    %24 = vector.load %arg3[%c0_6, %c0_7] : memref<128x128xbf16, #tpu.memory_space<vmem>>, vector<128x128xbf16>
    %cst_8 = arith.constant dense<0.000000e+00> : vector<128x128xf32>
    %25 = tpu.matmul %23, %24, %cst_8 {dimension_numbers = #tpu.dot_dimension_numbers<[1], [0], [0], [1], [0, 0, 1, 1], [], []>} : vector<128x128xbf16>, vector<128x128xbf16>, vector<128x128xf32> -> vector<128x128xf32>
    %c0_9 = arith.constant 0 : index
    %c0_10 = arith.constant 0 : index
    %26 = vector.load %arg4[%c0_9, %c0_10] : memref<1x128xf32, #tpu.memory_space<vmem>>, vector<1x128xf32>
    %27 = vector.broadcast %26 : vector<1x128xf32> to vector<128x128xf32>
    %28 = arith.addf %25, %27 : vector<128x128xf32>
    %cst_11 = arith.constant 0.000000e+00 : f32
    %29 = vector.broadcast %cst_11 : f32 to vector<128x128xf32>
    %30 = arith.cmpf ogt, %28, %29 : vector<128x128xf32>
    %cst_12 = arith.constant 0.00999999977 : f32
    %31 = vector.broadcast %cst_12 : f32 to vector<128x128xf32>
    %32 = arith.mulf %31, %28 : vector<128x128xf32>
    %33 = arith.select %30, %28, %32 : vector<128x128xi1>, vector<128x128xf32>
    %c0_13 = arith.constant 0 : index
    %c0_14 = arith.constant 0 : index
    %34 = vector.load %arg5[%c0_13, %c0_14] : memref<1x128xf32, #tpu.memory_space<vmem>>, vector<1x128xf32>
    %cst_15 = arith.constant dense<0.000000e+00> : vector<1x128xf32>
    %35 = tpu.matmul %34, %33, %cst_15 {dimension_numbers = #tpu.dot_dimension_numbers<[1], [1], [0], [0], [0, 0, 1, 0], [], []>} : vector<1x128xf32>, vector<128x128xf32>, vector<1x128xf32> -> vector<1x128xf32>
    %c0_16 = arith.constant 0 : index
    %c0_17 = arith.constant 0 : index
    %36 = memref.load %arg6[%c0_16, %c0_17] : memref<1x1xf32, #tpu.memory_space<smem>>
    %37 = vector.broadcast %36 : f32 to vector<1x128xf32>
    %38 = arith.addf %35, %37 : vector<1x128xf32>
    %cst_18 = arith.constant 5.000000e-01 : f32
    %39 = vector.broadcast %cst_18 : f32 to vector<1x128xf32>
    %40 = arith.mulf %39, %38 : vector<1x128xf32>
    %41 = math.tanh %40 : vector<1x128xf32>
    %cst_19 = arith.constant 1.000000e+00 : f32
    %42 = vector.broadcast %cst_19 : f32 to vector<1x128xf32>
    %43 = arith.addf %41, %42 : vector<1x128xf32>
    %cst_20 = arith.constant 5.000000e-01 : f32
    %44 = vector.broadcast %cst_20 : f32 to vector<1x128xf32>
    %45 = arith.mulf %44, %43 : vector<1x128xf32>
    %c0_21 = arith.constant 0 : index
    %c0_22 = arith.constant 0 : index
    %46 = vector.load %arg7[%c0_21, %c0_22] : memref<1x128xf32, #tpu.memory_space<vmem>>, vector<1x128xf32>
    tpu.vector_store %arg7[%c0_21, %c0_22], %45 {strides = array<i32>} : memref<1x128xf32, #tpu.memory_space<vmem>>, vector<1x128xf32>,
    return
  }
  func.func @transform_0(%arg0: i32) -> (i32, i32) {
    %c0_i32 = arith.constant 0 : i32
    %c0_i32_0 = arith.constant 0 : i32
    return %arg0, %c0_i32 : i32, i32
  }
  func.func @transform_1(%arg0: i32) -> (i32, i32) {
    %c0_i32 = arith.constant 0 : i32
    %c0_i32_0 = arith.constant 0 : i32
    return %arg0, %c0_i32 : i32, i32
  }
  func.func @transform_2(%arg0: i32) -> (i32, i32) {
    %c0_i32 = arith.constant 0 : i32
    %c0_i32_0 = arith.constant 0 : i32
    %c0_i32_1 = arith.constant 0 : i32
    return %c0_i32, %c0_i32_0 : i32, i32
  }
  func.func @transform_3(%arg0: i32) -> (i32, i32) {
    %c0_i32 = arith.constant 0 : i32
    %c0_i32_0 = arith.constant 0 : i32
    %c0_i32_1 = arith.constant 0 : i32
    return %c0_i32, %c0_i32_0 : i32, i32
  }
  func.func @transform_4(%arg0: i32) -> (i32, i32) {
    %c0_i32 = arith.constant 0 : i32
    %c0_i32_0 = arith.constant 0 : i32
    %c0_i32_1 = arith.constant 0 : i32
    return %c0_i32, %c0_i32_0 : i32, i32
  }
  func.func @transform_5(%arg0: i32) -> (i32, i32) {
    %c0_i32 = arith.constant 0 : i32
    %c0_i32_0 = arith.constant 0 : i32
    %c0_i32_1 = arith.constant 0 : i32
    return %c0_i32, %c0_i32_0 : i32, i32
  }
  func.func @transform_6(%arg0: i32) -> (i32, i32) {
    %c0_i32 = arith.constant 0 : i32
    %c0_i32_0 = arith.constant 0 : i32
    return %c0_i32, %arg0 : i32, i32
  }
}

</mosaic_0001>

<bundles_post_ra>
// kernel: tpu_custom_call.1
= control target key start
LH: loop header
LB: loop body
LE: loop exit
PB: predicated region body
PF: predicated region fallthrough
CT: control target
= control target key end

     0   :  { %s2750_s0 = inlined_call_operand.hbm [shape: bf16[192,128], index: 0, kind: input, shape index: {}]   ;;  %s2751_s1 = inlined_call_operand.hbm [shape: bf16[192,128], index: 1, kind: input, shape index: {}]   ;;  %s2752_s2 = inlined_call_operand.hbm [shape: bf16[128,128], index: 2, kind: input, shape index: {}]   ;;  %s2753_s3 = inlined_call_operand.vmem [shape: f32[1,128], index: 3, kind: input, shape index: {}]   ;;  %s2754_s4 = inlined_call_operand.vmem [shape: f32[1,128], index: 4, kind: input, shape index: {}]   ;;  %s2755_s5 = inlined_call_operand.<no memory space> [shape: f32[1,1], index: 5, kind: input, shape index: {}]   ;;  %s2756_s6 = inlined_call_operand.hbm [shape: f32[1,192], index: 6, kind: output, shape index: {}]  }
   0x1   :  { %2763 = sst [smem:[#allocation16_spill]] %s2750_s0 }
   0x2   :  { %11 = sst [smem:[#allocation2]] %s2755_s5 }
   0x3   :  { %12 = vsyncpa [#allocation4], 0 }
   0x4   :  { %14 = vsyncpa [#allocation4 + $0x1], 0 }
   0x5   :  { %15 = vsyncpa [#allocation7], 0 }
   0x6   :  { %17 = vsyncpa [#allocation7 + $0x1], 0 }
   0x7   :  { %18 = vsyncpa [#allocation5], 0 }
   0x8   :  { %20 = vsyncpa [#allocation5 + $0x1], 0  ;;  %s1904_s23 = smov 0   ;;  %s1906_s24 = smov 0  }
   0x9   :  { %s1908_s25 = smov 0   ;;  %s1910_s26 = smov 0  }
   0xa LB: > { %s1925_s5 = sadd.s32 4294967295, %s1851_s26   ;;  %s1256_s27 = sadd.s32 4294967294, %s1851_s26   ;;  %s1851_s26 = sphi %s1910_s26, %s2786_s26   ;;  %s1847_s25 = sphi %s1908_s25, %s2785_s25   ;;  %s1843_s24 = sphi %s1906_s24, %s2784_s24   ;;  %s1839_s23 = sphi %s1904_s23, %s2783_s23  }
   0xb   : > { %s1929_s28 = sadd.s32 1, %s1851_s26   ;;  %s33_s29 = sadd.s32 1, %s1847_s25 }
   0xc   : > { %s30_s30 = ssub.s32 %s1851_s26, %s1929_s28  ;;  %p40_p0 = scmp.ne.s32.totalorder %s1847_s25, %s1843_s24 }
   0xd   : > { %p31_p1 = scmp.eq.s32.totalorder %s30_s30, 0  ;;  %p41_p2 = scmp.eq.s32.totalorder %s1851_s26, 0 }
   0xe   : > { %p46_p3 = scmp.ne.s32.totalorder %s1843_s24, %s1839_s23  ;;  %p2757_p4 = scmp.eq.s32.totalorder %s1925_s5, 0 }
   0xf   : > { %s1941_s7 = scalar_select %p31_p1, %s1847_s25, %s33_s29  }
  0x10   : > { %p1943_p5 = por %p41_p2, %p40_p0  ;;  %p1949_p6 = por %p2757_p4, %p46_p3 }
  0x11   : > { %p180_p7 = scmp.eq.s32.totalorder %s1925_s5, 1  ;;  %p186_p8 = scmp.eq.s32.totalorder %s1256_s27, 1 }
  0x12   : > { %s2764_s8 = scalar_select %p1943_p5, 1, 0 }
  0x13   : > { %s2765_s9 = scalar_select %p1949_p6, 1, 0 }
  0x14   : > { %p1257_p9 = scmp.ge.s32.totalorder %s1851_s26, 1  ;;  %p193_p10 = scmp.lt.s32.totalorder %s1851_s26, 3 }
  0x15   : > { %p1956_p11 = por %p180_p7, %p40_p0  ;;  %p1960_p12 = por %p186_p8, %p46_p3 }
  0x16   : > { %p1964_p13 = pnand %p1257_p9, %p193_p10  ;;  %s1853_s13 = smov [#allocation8]  }
  0x17   : > { %s2766_s10 = scalar_select %p1956_p11, 1, 0 }
  0x18   : > { %s2767_s11 = scalar_select %p1960_p12, 1, 0 }
  0x19   : > { %s2768_s12 = scalar_select %p1964_p13, 1, 0 }
  0x1a   : > { %p1502_p1 = pneg %p1964_p13  ;;  %s205_s14 = sshll.u32 %s1853_s13, 4  ;;  %s206_s14 = int_to_ptr.vmem [resolvable:$true] %s205_s14 }
  0x1b   : > { %s1693_s18 = scalar_lea.hbm %s2752_s2, 1024 }
  0x1c   : > { %p1972_p2 = pnand %p1502_p1, %p2757_p4  ;;  %p1694_p0 = scmp.ne.s32.totalorder %s2752_s2, %s1693_s18 }
  0x1d   : > { %p1700_p9 = scmp.lt.u32.totalorder %s1693_s18, %s2752_s2 }
  0x1e   : > { %p1695_p3 = pneg %p1972_p2 }
  0x20   : > { %p1696_p7 = pnand %p1695_p3, %p1694_p0 }
  0x22   : > { %p1697_p8 = pneg %p1696_p7 }
  0x24   : > { %p1702_p10 = pnand %p1700_p9, %p1697_p8 }
  0x26   : > { %1705 = shalt.err (!%p1702_p10)
}
  0x27   : > { %s1706_s27 = scalar_lea.vmem %s206_s14, 1024  ;;  %p1714_p11 = scmp.lt.s32.totalorder %s206_s14, %s206_s14 }
  0x28   : > { %p1707_p1 = scmp.ne.s32.totalorder %s206_s14, %s1706_s27  ;;  %p1715_p6 = scmp.lt.s32.totalorder %s1706_s27, %s1706_s27 }
  0x2a   : > { %p1709_p4 = pnand %p1707_p1, %p1695_p3  ;;  %p1716_p13 = por %p1715_p6, %p1714_p11 }
  0x2c   : > { %p1710_p12 = pneg %p1709_p4 }
  0x2e   : > { %p1717_p5 = pnand %p1716_p13, %p1710_p12 }
  0x30   : > { %1720 = shalt.err (!%p1717_p5)
}
  0x31   : > { %s1854_s29 = smov 64   ;;  %s1855_s30 = smov 4  }
  0x32   : > { %1505 = dma.hbm_to_vmem [thread:$0]  (!%p1972_p2), %s2752_s2, 1024, %s206_s14, [#allocation7], %s1854_s29, %s1854_s29, %s1855_s30  }
  0x33   : > { %p1259_p0 = scmp.ge.s32.totalorder %s1851_s26, 2 }
  0x34   : > { %p2770_p4 = scmp.ne.s32.totalorder (!%p1259_p0), %s2764_s8, 0 }
  0x35   : > { %224 = sbr.rel (%p1259_p0) target bundleno = 137 (0x89), region = 32 }
  0x3c   : > { %227 = sbr.rel (!%p2770_p4) target bundleno = 100 (0x64), region = 36  ;;  %s228_s17 = sand.u32 (%p2770_p4), 1, %s1847_s25  }
  0x3d   : > { %s1261_s18 = sshll.u32 (%p2770_p4), %s1851_s26, 4  ;;  %s1260_s19 = sshll.u32 (%p2770_p4), %s228_s17, 6 }
  0x3e   : > { %s234_s20 = ssub.s32 (%p2770_p4), 24, %s1261_s18  ;;  %s2002_s21 = scalar_lea.sflag (%p2770_p4), [#allocation4], %s228_s17 }
  0x3f   : > { %p235_p5 = scmp.lt.s32.totalorder (%p2770_p4), %s234_s20, 16  ;;  %s232_s22 = scalar_lea.vmem (%p2770_p4), [#allocation3], %s1260_s19 }
  0x43   : > { %s2788_s20 = smov (!%p235_p5, %s234_s20), 16 }
  0x44   : > { %s1999_s15 = sshll.u32 %s2788_s20, 6 }
  0x45   : > { %s239_s14 = ssub.s32 1024, %s1999_s15 }
  0x46   : > { %240 = vsyncadd %s2002_s21, %s239_s14  ;;  %p1263_p6 = scmp.ne.s32.totalorder %s1999_s15, 0  ;;  %s1290_s27 = sshll.u32 %s1851_s26, 10 }
  0x47   : > { %s2771_s0 = sld [smem:[#allocation16_spill]]  ;;  %s245_s16 = sshll.u32 %s232_s22, 4  ;;  %s2012_s16 = int_to_ptr.vmem [resolvable:$true] %s245_s16 }
  0x4d   : > { %s2010_s13 = scalar_lea.hbm %s2771_s0, %s1290_s27  ;;  %s1725_s20 = scalar_lea.hbm %s2771_s0, 1536 }
  0x4e   : > { %s1721_s17 = scalar_lea.hbm %s2010_s13, %s1999_s15  ;;  %p1726_p2 = scmp.lt.u32.totalorder %s2010_s13, %s2771_s0 }
  0x4f   : > { %p1722_p11 = scmp.ne.s32.totalorder %s2010_s13, %s1721_s17  ;;  %p1727_p3 = scmp.lt.u32.totalorder %s1725_s20, %s1721_s17 }
  0x50   : > { %p1729_p8 = scmp.lt.u32.totalorder %s1721_s17, %s2010_s13 }
  0x51   : > { %p1723_p12 = pnand %p1722_p11, %p1263_p6  ;;  %p1728_p7 = por %p1727_p3, %p1726_p2 }
  0x53   : > { %p1724_p13 = pneg %p1723_p12  ;;  %p1730_p9 = por %p1729_p8, %p1728_p7 }
  0x55   : > { %p1731_p10 = pnand %p1730_p9, %p1724_p13 }
  0x57   : > { %1734 = shalt.err (!%p1731_p10)
}
  0x58   : > { %s1735_s22 = scalar_lea.vmem %s2012_s16, %s1999_s15  ;;  %s1856_s27 = smov [#allocation3]  }
  0x59   : > { %p1736_p1 = scmp.ne.s32.totalorder %s2012_s16, %s1735_s22  ;;  %s1739_s30 = sshll.u32 %s1856_s27, 4  ;;  %s1740_s30 = int_to_ptr.vmem [resolvable:$false] %s1739_s30 }
  0x5a   : > { %s1741_s18 = scalar_lea.vmem %s1740_s30, 2048  ;;  %p1742_p11 = scmp.lt.s32.totalorder %s2012_s16, %s1740_s30 }
  0x5b   : > { %p1737_p4 = pnand %p1736_p1, %p1263_p6  ;;  %p1743_p12 = scmp.lt.s32.totalorder %s1741_s18, %s1735_s22 }
  0x5d   : > { %p1738_p5 = pneg %p1737_p4  ;;  %p1744_p2 = por %p1743_p12, %p1742_p11 }
  0x5f   : > { %p1745_p3 = pnand %p1744_p2, %p1738_p5 }
  0x61   : > { %1748 = shalt.err (!%p1745_p3)
}
  0x62   : > { %s1857_s17 = smov 64   ;;  %s1858_s19 = smov 4  }
  0x63   : > { %251 = dma.hbm_to_vmem [thread:$0]  (%p1263_p6), %s2010_s13, %s1999_s15, %s2012_s16, %s2002_s21, %s1857_s17, %s1857_s17, %s1858_s19  }
  0x64 PF: > { %p2772_p13 = scmp.ne.s32.totalorder %s2764_s8, 0 }
  0x65   : > { %s255_s20 = sand.u32 (%p2772_p13), 1, %s1851_s26   ;;  %s257_s14 = sand.u32 (%p2772_p13), 1, %s1847_s25  }
  0x66   : > { %254 = sbr.rel (!%p2772_p13) target bundleno = 137 (0x89), region = 40  ;;  %s1267_s29 = sshll.u32 (%p2772_p13), %s257_s14, 6 }
  0x67   : > { %s1268_s22 = sshll.u32 (%p2772_p13), %s1851_s26, 4  ;;  %s2047_s0 = scalar_lea.sflag (%p2772_p13), [#allocation7], %s255_s20 }
  0x68   : > { %s261_s27 = ssub.s32 (%p2772_p13), 24, %s1268_s22  ;;  %s259_s15 = scalar_lea.vmem (%p2772_p13), [#allocation6], %s1267_s29 }
  0x69   : > { %p262_p7 = scmp.lt.s32.totalorder (%p2772_p13), %s261_s27, 16 }
  0x6d   : > { %s2790_s27 = smov (!%p262_p7, %s261_s27), 16 }
  0x6e   : > { %s2044_s30 = sshll.u32 %s2790_s27, 6 }
  0x6f   : > { %s266_s18 = ssub.s32 1024, %s2044_s30 }
  0x70   : > { %267 = vsyncadd %s2047_s0, %s266_s18  ;;  %p1270_p6 = scmp.ne.s32.totalorder %s2044_s30, 0  ;;  %s1291_s8 = sshll.u32 %s1851_s26, 10 }
  0x71   : > { %s2055_s16 = scalar_lea.hbm %s2751_s1, %s1291_s8  ;;  %s272_s17 = sshll.u32 %s259_s15, 4  ;;  %s2057_s17 = int_to_ptr.vmem [resolvable:$true] %s272_s17 }
  0x72   : > { %s1749_s19 = scalar_lea.hbm %s2055_s16, %s2044_s30  ;;  %s1753_s29 = scalar_lea.hbm %s2751_s1, 1536 }
  0x73   : > { %p1750_p8 = scmp.ne.s32.totalorder %s2055_s16, %s1749_s19  ;;  %p1754_p1 = scmp.lt.u32.totalorder %s2055_s16, %s2751_s1 }
  0x74   : > { %p1755_p4 = scmp.lt.u32.totalorder %s1753_s29, %s1749_s19  ;;  %p1757_p11 = scmp.lt.u32.totalorder %s1749_s19, %s2055_s16 }
  0x75   : > { %p1751_p9 = pnand %p1750_p8, %p1270_p6 }
  0x76   : > { %p1756_p5 = por %p1755_p4, %p1754_p1 }
  0x77   : > { %p1752_p10 = pneg %p1751_p9 }
  0x78   : > { %p1758_p12 = por %p1757_p11, %p1756_p5 }
  0x7a   : > { %p1759_p2 = pnand %p1758_p12, %p1752_p10 }
  0x7c   : > { %1762 = shalt.err (!%p1759_p2)
}
  0x7d   : > { %s1763_s18 = scalar_lea.vmem %s2057_s17, %s2044_s30  ;;  %s1859_s15 = smov [#allocation6]  }
  0x7e   : > { %p1764_p3 = scmp.ne.s32.totalorder %s2057_s17, %s1763_s18  ;;  %s1767_s8 = sshll.u32 %s1859_s15, 4  ;;  %s1768_s8 = int_to_ptr.vmem [resolvable:$false] %s1767_s8 }
  0x7f   : > { %s1769_s21 = scalar_lea.vmem %s1768_s8, 2048  ;;  %p1770_p8 = scmp.lt.s32.totalorder %s2057_s17, %s1768_s8 }
  0x80   : > { %p1765_p13 = pnand %p1764_p3, %p1270_p6  ;;  %p1771_p9 = scmp.lt.s32.totalorder %s1769_s21, %s1763_s18 }
  0x82   : > { %p1766_p7 = pneg %p1765_p13  ;;  %p1772_p1 = por %p1771_p9, %p1770_p8 }
  0x84   : > { %p1773_p4 = pnand %p1772_p1, %p1766_p7 }
  0x86   : > { %1776 = shalt.err (!%p1773_p4)
}
  0x87   : > { %s1860_s13 = smov 64   ;;  %s1861_s19 = smov 4  }
  0x88   : > { %278 = dma.hbm_to_vmem [thread:$0]  (%p1270_p6), %s2055_s16, %s2044_s30, %s2057_s17, %s2047_s0, %s1860_s13, %s1860_s13, %s1861_s19  }
  0x89 PF: > { %p2773_p10 = scmp.ne.s32.totalorder %s2768_s12, 0 }
  0x8b   : > { %284 = sbr.rel (%p2773_p10) target bundleno = 902 (0x386), region = 44 }
  0x92   : > { %s2087_s20 = sand.u32 1, %s1843_s24   ;;  %p2774_p5 = scmp.ne.s32.totalorder %s2765_s9, 0 }
  0x93   : > { %s1275_s14 = sshll.u32 %s2087_s20, 6  ;;  %s287_s29 = scalar_lea.sflag [#allocation4], %s2087_s20 }
  0x94   : > { %s2091_s22 = scalar_lea.vmem [#allocation3], %s1275_s14 }
  0x95   : > { %1822 = dma.done.wait (%p2774_p5), %s287_s29, 1024  }
  0x96   : > { %1824 = vsyncadd (%p2774_p5), %s287_s29, 4294966272  ;;  %s295_s0 = sand.u32 1, %s1925_s5   ;;  %s2098_s30 = scalar_lea.vmem [#allocation6], %s1275_s14 }
  0x97   : > { %s296_s12 = scalar_lea.sflag [#allocation7], %s295_s0 }
  0x98   : > { %1826 = dma.done.wait (%p2774_p5), %s296_s12, 1024  }
  0x99   : > { %1828 = vsyncadd (%p2774_p5), %s296_s12, 4294966272  ;;  %p2775_p6 = scmp.eq.s32.totalorder %s1925_s5, 0 }
  0x9b   : > { %1830 = dma.done.wait (%p2775_p6), [#allocation7], 1024   ;;  %p2776_p11 = pmov %p2775_p6 }
  0x9c   : > { %v1325_v0 = vld [vmem:[%s2098_s30] sm:$0xff]   ;;  %v1356_v6 = vld [vmem:[%s2091_s22 + $0x8] sm:$0xff]   ;;  %v1357_v18 = vld [vmem:[%s2091_s22 + $0x10] sm:$0xff]   ;;  %s1068_s18 = sld [smem:[#allocation2]]  ;;  %s1287_s15 = sshll.u32 %s1925_s5, 4 }
  0x9d   : > { %1832 = vsyncadd (%p2776_p11), [#allocation7], 4294966272  ;;  %v1293_v1 = vld [vmem:[%s2091_s22] sm:$0xff]   ;;  %v2110_v2 = vunpack.c.l.bf16 %v1325_v0  ;;  %v2114_v4 = vunpack.c.h.bf16 %v1325_v0  ;;  %v2127_v11 = vunpack.c.h.bf16 %v1356_v6  ;;  %v2129_v12 = vunpack.c.l.bf16 %v1356_v6  ;;  %v1363_v13 = vld [vmem:[%s2098_s30 + $0x8] sm:$0xff]   ;;  %s335_s8 = scalar_lea.vmem [#allocation9], %s2087_s20  ;;  %s2706_s14 = scalar_lea.hbm %s2756_s6, %s1287_s15 }
  0x9e   : > { %v2112_v3 = vunpack.c.l.bf16 %v1293_v1  ;;  %v2116_v5 = vunpack.c.h.bf16 %v1293_v1  ;;  %v2136_v16 = vunpack.c.h.bf16 %v1363_v13  ;;  %v2138_v17 = vunpack.c.l.bf16 %v1363_v13  ;;  %v1364_v23 = vld [vmem:[%s2098_s30 + $0x10] sm:$0xff]   ;;  %v1358_v28 = vld [vmem:[%s2091_s22 + $0x18] sm:$0xff]   ;;  %v1359_v38 = vld [vmem:[%s2091_s22 + $0x20] sm:$0xff]   ;;  %s1158_s21 = sshll.u32 %s335_s8, 4  ;;  %s1146_s29 = scalar_lea.sflag [#allocation5], %s2087_s20  ;;  %s2708_s21 = int_to_ptr.vmem [resolvable:$true] %s1158_s21 }
  0x9f   : > { %v571_v7 = vmul.f32 %v2110_v2, %v2110_v2  ;;  %v572_v9 = vmul.f32 %v2114_v4, %v2114_v4  ;;  %v414_v14 = vmul.f32 %v2127_v11, %v2127_v11  ;;  %v413_v15 = vmul.f32 %v2129_v12, %v2129_v12  ;;  %v1365_v33 = vld [vmem:[%s2098_s30 + $0x18] sm:$0xff]   ;;  %v1366_v43 = vld [vmem:[%s2098_s30 + $0x20] sm:$0xff]   ;;  %v1360_v49 = vld [vmem:[%s2091_s22 + $0x28] sm:$0xff]   ;;  %p2781_p2 = scmp.ne.s32.totalorder %s2766_s10, 0  ;;  %s1865_s5 = smov [#allocation9]  }
  0xa0   : > { %v411_v8 = vmul.f32 %v2112_v3, %v2112_v3  ;;  %v412_v10 = vmul.f32 %v2116_v5, %v2116_v5  ;;  %v574_v19 = vmul.f32 %v2136_v16, %v2136_v16  ;;  %v573_v20 = vmul.f32 %v2138_v17, %v2138_v17  ;;  %v1555_v48 = vld [vmem:[#allocation8] sm:$0xff]   ;;  %v1367_v54 = vld [vmem:[%s2098_s30 + $0x28] sm:$0xff]   ;;  %v1361_v60 = vld [vmem:[%s2091_s22 + $0x30] sm:$0xff]   ;;  %s1781_s0 = sshll.u32 %s1865_s5, 4  ;;  %s1782_s0 = int_to_ptr.vmem [resolvable:$false] %s1781_s0 }
  0xa1   : > { %587 = vadd.xlane.f32.xlu1 %v571_v7  ;;  %v2145_v21 = vunpack.c.h.bf16 %v1357_v18  ;;  %v2147_v22 = vunpack.c.l.bf16 %v1357_v18  ;;  %v2154_v26 = vunpack.c.h.bf16 %v1364_v23  ;;  %v2156_v27 = vunpack.c.l.bf16 %v1364_v23  ;;  %1403 = vmatprep.subr.bf16.mxu0 %v1555_v48  ;;  %v1556_v55 = vld [vmem:[#allocation8 + $0x8] sm:$0xff]   ;;  %v1557_v61 = vld [vmem:[#allocation8 + $0x10] sm:$0xff]   ;;  %v1558_v13 = vld [vmem:[#allocation8 + $0x18] sm:$0xff]   ;;  %s1783_s12 = scalar_lea.vmem %s1782_s0, 32  ;;  %p1784_p7 = scmp.lt.s32.totalorder %s2708_s21, %s1782_s0 }
  0xa2   : > { %427 = vadd.xlane.f32.xlu0 %v411_v8  ;;  %v2163_v31 = vunpack.c.h.bf16 %v1358_v28  ;;  %v2165_v32 = vunpack.c.l.bf16 %v1358_v28  ;;  %v2172_v36 = vunpack.c.h.bf16 %v1365_v33  ;;  %v2174_v37 = vunpack.c.l.bf16 %v1365_v33  ;;  %1404 = vmatpush3.bf16.msra.mxu0 %v1555_v48  ;;  %v1368_v6 = vld [vmem:[%s2098_s30 + $0x30] sm:$0xff]   ;;  %v1559_v23 = vld [vmem:[#allocation8 + $0x20] sm:$0xff]   ;;  %v1560_v33 = vld [vmem:[#allocation8 + $0x28] sm:$0xff]  }
  0xa3   : > { %v416_v24 = vmul.f32 %v2145_v21, %v2145_v21  ;;  %v415_v25 = vmul.f32 %v2147_v22, %v2147_v22  ;;  %v576_v29 = vmul.f32 %v2154_v26, %v2154_v26  ;;  %v575_v30 = vmul.f32 %v2156_v27, %v2156_v27  ;;  %1405 = vmatprep.subr.bf16.mxu0 %v1556_v55 }
  0xa4   : > { %v418_v34 = vmul.f32 %v2163_v31, %v2163_v31  ;;  %v417_v35 = vmul.f32 %v2165_v32, %v2165_v32  ;;  %v578_v39 = vmul.f32 %v2172_v36, %v2172_v36  ;;  %v577_v40 = vmul.f32 %v2174_v37, %v2174_v37 }
  0xa5   : > { %589 = vadd.xlane.f32.xlu1 %v572_v9  ;;  %v2181_v41 = vunpack.c.h.bf16 %v1359_v38  ;;  %v2183_v42 = vunpack.c.l.bf16 %v1359_v38  ;;  %v2190_v46 = vunpack.c.h.bf16 %v1366_v43  ;;  %v2192_v47 = vunpack.c.l.bf16 %v1366_v43  ;;  %v1561_v38 = vld [vmem:[#allocation8 + $0x30] sm:$0xff]  }
  0xa6   : > { %429 = vadd.xlane.f32.xlu0 %v412_v10  ;;  %v2199_v52 = vunpack.c.h.bf16 %v1360_v49  ;;  %v2201_v53 = vunpack.c.l.bf16 %v1360_v49  ;;  %v2208_v58 = vunpack.c.h.bf16 %v1367_v54  ;;  %v2210_v59 = vunpack.c.l.bf16 %v1367_v54  ;;  %1406 = vmatpush3.bf16.msra.mxu0 %v1556_v55 }
  0xa7   : > { %v420_v44 = vmul.f32 %v2181_v41, %v2181_v41  ;;  %v419_v45 = vmul.f32 %v2183_v42, %v2183_v42  ;;  %v580_v50 = vmul.f32 %v2190_v46, %v2190_v46  ;;  %v579_v51 = vmul.f32 %v2192_v47, %v2192_v47  ;;  %1407 = vmatprep.subr.bf16.mxu0 %v1557_v61 }
  0xa8   : > { %v422_v56 = vmul.f32 %v2199_v52, %v2199_v52  ;;  %v421_v57 = vmul.f32 %v2201_v53, %v2201_v53  ;;  %v582_v62 = vmul.f32 %v2208_v58, %v2208_v58  ;;  %v581_v63 = vmul.f32 %v2210_v59, %v2210_v59 }
  0xa9   : > { %433 = vadd.xlane.f32.xlu1 %v414_v14  ;;  %v2217_v0 = vunpack.c.h.bf16 %v1361_v60  ;;  %v2219_v1 = vunpack.c.l.bf16 %v1361_v60  ;;  %v2226_v9 = vunpack.c.h.bf16 %v1368_v6  ;;  %v2228_v10 = vunpack.c.l.bf16 %v1368_v6  ;;  %v1362_v14 = vld [vmem:[%s2091_s22 + $0x38] sm:$0xff]   ;;  %s1777_s22 = scalar_lea.vmem %s2708_s21, 16 }
  0xaa   : > { %431 = vadd.xlane.f32.xlu0 %v413_v15  ;;  %1408 = vmatpush3.bf16.msra.mxu0 %v1557_v61  ;;  %p1778_p12 = scmp.ne.s32.totalorder %s2708_s21, %s1777_s22  ;;  %p1785_p8 = scmp.lt.s32.totalorder %s1783_s12, %s1777_s22 }
  0xab   : > { %v424_v7 = vmul.f32 %v2217_v0, %v2217_v0  ;;  %v423_v8 = vmul.f32 %v2219_v1, %v2219_v1  ;;  %1409 = vmatprep.subr.bf16.mxu0 %v1558_v13  ;;  %v584_v15 = vmul.f32 %v2226_v9, %v2226_v9  ;;  %v583_v18 = vmul.f32 %v2228_v10, %v2228_v10 }
  0xac   : > { %p1779_p3 = pnand %p1778_p12, %p2781_p2  ;;  %p1786_p9 = por %p1785_p8, %p1784_p7 }
  0xad   : > { %593 = vadd.xlane.f32.xlu1 %v574_v19  ;;  %v2235_v19 = vunpack.c.h.bf16 %v1362_v14 }
  0xae   : > { %591 = vadd.xlane.f32.xlu0 %v573_v20  ;;  %1410 = vmatpush3.bf16.msra.mxu0 %v1558_v13  ;;  %v2237_v20 = vunpack.c.l.bf16 %v1362_v14  ;;  %p1780_p13 = pneg %p1779_p3 }
  0xaf   : > { %1411 = vmatprep.subr.bf16.mxu0 %v1559_v23 }
  0xb0   : > { %2777 = vst [vmem:[#allocation14_spill] sm:$0xff] %v2237_v20  ;;  %v425_v28 = vmul.f32 %v2237_v20, %v2237_v20  ;;  %p1787_p1 = pnand %p1786_p9, %p1780_p13 }
  0xb1   : > { %437 = vadd.xlane.f32.xlu1 %v416_v24  ;;  %v1369_v24 = vld [vmem:[%s2098_s30 + $0x38] sm:$0xff]  }
  0xb2   : > { %435 = vadd.xlane.f32.xlu0 %v415_v25  ;;  %1412 = vmatpush3.bf16.msra.mxu0 %v1559_v23  ;;  %v426_v25 = vmul.f32 %v2235_v19, %v2235_v19 }
  0xb3   : > { %1413 = vmatprep.subr.bf16.mxu0 %v1560_v33 }
  0xb5   : > { %597 = vadd.xlane.f32.xlu1 %v576_v29  ;;  %v2244_v29 = vunpack.c.h.bf16 %v1369_v24 }
  0xb6   : > { %595 = vadd.xlane.f32.xlu0 %v575_v30  ;;  %v2246_v30 = vunpack.c.l.bf16 %v1369_v24  ;;  %1414 = vmatpush3.bf16.msra.mxu0 %v1560_v33 }
  0xb7   : > { %1415 = vmatprep.subr.bf16.mxu0 %v1561_v38 }
  0xb8   : > { %2778 = vst [vmem:[#allocation15_spill] sm:$0xff] %v2246_v30 }
  0xb9   : > { %441 = vadd.xlane.f32.xlu1 %v418_v34  ;;  %v586_v34 = vmul.f32 %v2244_v29, %v2244_v29 }
  0xba   : > { %439 = vadd.xlane.f32.xlu0 %v417_v35  ;;  %v585_v35 = vmul.f32 %v2246_v30, %v2246_v30  ;;  %1416 = vmatpush3.bf16.msra.mxu0 %v1561_v38 }
  0xbd   : > { %601 = vadd.xlane.f32.xlu1 %v578_v39  ;;  %v1562_v39 = vld [vmem:[#allocation8 + $0x38] sm:$0xff]  }
  0xbe   : > { %599 = vadd.xlane.f32.xlu0 %v577_v40  ;;  %1417 = vmatprep.subr.bf16.mxu0 %v1562_v39 }
  0xbf   : > { %1418 = vmatpush3.bf16.msra.mxu0 %v1562_v39 }
  0xc1   : > { %445 = vadd.xlane.f32.xlu1 %v420_v44 }
  0xc2   : > { %443 = vadd.xlane.f32.xlu0 %v419_v45 }
  0xc5   : > { %605 = vadd.xlane.f32.xlu1 %v580_v50 }
  0xc6   : > { %603 = vadd.xlane.f32.xlu0 %v579_v51 }
  0xc9   : > { %449 = vadd.xlane.f32.xlu1 %v422_v56 }
  0xca   : > { %447 = vadd.xlane.f32.xlu0 %v421_v57 }
  0xcd   : > { %609 = vadd.xlane.f32.xlu1 %v582_v62 }
  0xce   : > { %607 = vadd.xlane.f32.xlu0 %v581_v63 }
  0xd1   : > { %453 = vadd.xlane.f32.xlu1 %v424_v7 }
  0xd2   : > { %451 = vadd.xlane.f32.xlu0 %v423_v8 }
  0xd5   : > { %613 = vadd.xlane.f32.xlu1 %v584_v15 }
  0xd6   : > { %611 = vadd.xlane.f32.xlu0 %v583_v18 }
  0xd9   : > { %457 = vadd.xlane.f32.xlu1 %v426_v25 }
  0xda   : > { %455 = vadd.xlane.f32.xlu0 %v425_v28 }
  0xdd   : > { %617 = vadd.xlane.f32.xlu1 %v586_v34 }
  0xde   : > { %615 = vadd.xlane.f32.xlu0 %v585_v35 }
 0x12e   : > { %v588_v40 = vpop.xlane.xlu1 %587 }
 0x12f   : > { %v428_v43 = vpop.xlane.xlu0 %427  ;;  %1563 = vrsqrt.f32 %v588_v40  ;;  %vm621_vm0 = vcmp.eq.f32.partialorder %v588_v40, inf  ;;  %vm623_vm1 = vcmp.eq.f32.partialorder %v588_v40, 0.0  ;;  %v624_v51 = vand.u32 2147483648, %v588_v40 }
 0x130   : > { %1565 = vrsqrt.f32 %v428_v43  ;;  %vm461_vm2 = vcmp.eq.f32.partialorder %v428_v43, inf  ;;  %vm463_vm3 = vcmp.eq.f32.partialorder %v428_v43, 0.0  ;;  %v464_v56 = vand.u32 2147483648, %v428_v43 }
 0x132   : > { %v590_v44 = vpop.xlane.xlu1 %589 }
 0x133   : > { %v430_v45 = vpop.xlane.xlu0 %429  ;;  %1567 = vrsqrt.f32 %v590_v44  ;;  %vm628_vm4 = vcmp.eq.f32.partialorder %v590_v44, inf  ;;  %vm630_vm5 = vcmp.eq.f32.partialorder %v590_v44, 0.0  ;;  %v631_v62 = vand.u32 2147483648, %v590_v44 }
 0x134   : > { %1569 = vrsqrt.f32 %v430_v45  ;;  %vm468_vm6 = vcmp.eq.f32.partialorder %v430_v45, inf  ;;  %vm470_vm7 = vcmp.eq.f32.partialorder %v430_v45, 0.0  ;;  %v471_v6 = vand.u32 2147483648, %v430_v45 }
 0x136   : > { %v2252_v48 = vpop.xlane.xlu1 %433 }
 0x137   : > { %v2254_v49 = vpop.xlane.xlu0 %431  ;;  %1571 = vrsqrt.f32 %v2252_v48  ;;  %vm482_vm8 = vcmp.eq.f32.partialorder %v2252_v48, inf  ;;  %vm484_vm9 = vcmp.eq.f32.partialorder %v2252_v48, 0.0  ;;  %v485_v23 = vand.u32 2147483648, %v2252_v48 }
 0x138   : > { %1573 = vrsqrt.f32 %v2254_v49  ;;  %vm475_vm10 = vcmp.eq.f32.partialorder %v2254_v49, inf  ;;  %vm477_vm11 = vcmp.eq.f32.partialorder %v2254_v49, 0.0  ;;  %v478_v38 = vand.u32 2147483648, %v2254_v49 }
 0x139   : > { %v1564_v50 = vpop.eup %1563 }
 0x13a   : > { %v1566_v54 = vpop.eup %1565  ;;  %v620_v55 = vmul.f32 %v1564_v50, %v588_v40  ;;  %v2258_v57 = vpop.xlane.xlu1 %593 }
 0x13b   : > { %v2260_v60 = vpop.xlane.xlu0 %591  ;;  %v460_v61 = vmul.f32 %v1566_v54, %v428_v43  ;;  %1575 = vrsqrt.f32 %v2258_v57  ;;  %vm642_vm12 = vcmp.eq.f32.partialorder %v2258_v57, inf  ;;  %vm644_vm13 = vcmp.eq.f32.partialorder %v2258_v57, 0.0 }
 0x13c   : > { %v622_v63 = vsel %vm621_vm0, %v588_v40, %v620_v55  ;;  %1577 = vrsqrt.f32 %v2260_v60  ;;  %v645_v50 = vand.u32 2147483648, %v2258_v57  ;;  %vm635_vm14 = vcmp.eq.f32.partialorder %v2260_v60, inf }
 0x13d   : > { %v1568_v7 = vpop.eup %1567  ;;  %v625_v8 = vsel %vm623_vm1, %v624_v51, %v622_v63  ;;  %v462_v13 = vsel %vm461_vm2, %v428_v43, %v460_v61  ;;  %vm637_vm15 = vcmp.eq.f32.partialorder %v2260_v60, 0.0 }
 0x13e   : > { %v1570_v14 = vpop.eup %1569  ;;  %v465_v15 = vsel %vm463_vm3, %v464_v56, %v462_v13  ;;  %v627_v18 = vmul.f32 %v1568_v7, %v590_v44  ;;  %v2272_v24 = vpop.xlane.xlu1 %437  ;;  %v779_v28 = vadd.f32 1e-06, %v625_v8 }
 0x13f   : > { %v2274_v25 = vpop.xlane.xlu0 %435  ;;  %v467_v33 = vmul.f32 %v1570_v14, %v430_v45  ;;  %1579 = vrsqrt.f32 %v2272_v24  ;;  %v731_v34 = vadd.f32 1e-06, %v465_v15  ;;  %vm496_vm0 = vcmp.eq.f32.partialorder %v2272_v24, inf }
 0x140   : > { %v629_v35 = vsel %vm628_vm4, %v590_v44, %v627_v18  ;;  %1581 = vrsqrt.f32 %v2274_v25  ;;  %vm498_vm1 = vcmp.eq.f32.partialorder %v2272_v24, 0.0  ;;  %vm489_vm2 = vcmp.eq.f32.partialorder %v2274_v25, inf }
 0x141   : > { %v1572_v39 = vpop.eup %1571  ;;  %v632_v40 = vsel %vm630_vm5, %v631_v62, %v629_v35  ;;  %v469_v43 = vsel %vm468_vm6, %v430_v45, %v467_v33  ;;  %1583 = vrcp.f32 %v779_v28  ;;  %vm491_vm3 = vcmp.eq.f32.partialorder %v2274_v25, 0.0 }
 0x142   : > { %v1574_v51 = vpop.eup %1573  ;;  %v780_v54 = vadd.f32 1e-06, %v632_v40  ;;  %v472_v55 = vsel %vm470_vm7, %v471_v6, %v469_v43  ;;  %v481_v56 = vmul.f32 %v1572_v39, %v2252_v48  ;;  %v2288_v61 = vpop.xlane.xlu1 %597  ;;  %1585 = vrcp.f32 %v731_v34 }
 0x143   : > { %v2290_v63 = vpop.xlane.xlu0 %595  ;;  %v474_v44 = vmul.f32 %v1574_v51, %v2254_v49  ;;  %v732_v62 = vadd.f32 1e-06, %v472_v55  ;;  %v638_v6 = vand.u32 2147483648, %v2260_v60  ;;  %vm656_vm4 = vcmp.eq.f32.partialorder %v2288_v61, inf }
 0x144   : > { %v483_v45 = vsel %vm482_vm8, %v2252_v48, %v481_v56  ;;  %1587 = vrcp.f32 %v780_v54  ;;  %vm658_vm5 = vcmp.eq.f32.partialorder %v2288_v61, 0.0  ;;  %vm649_vm6 = vcmp.eq.f32.partialorder %v2290_v63, inf }
 0x145   : > { %v1576_v7 = vpop.eup %1575  ;;  %v486_v8 = vsel %vm484_vm9, %v485_v23, %v483_v45  ;;  %v476_v13 = vsel %vm475_vm10, %v2254_v49, %v474_v44  ;;  %1589 = vrsqrt.f32 %v2288_v61  ;;  %v499_v23 = vand.u32 2147483648, %v2272_v24 }
 0x146   : > { %v1578_v14 = vpop.eup %1577  ;;  %v734_v15 = vadd.f32 1e-06, %v486_v8  ;;  %v479_v18 = vsel %vm477_vm11, %v478_v38, %v476_v13  ;;  %v641_v28 = vmul.f32 %v1576_v7, %v2258_v57  ;;  %v2309_v33 = vpop.xlane.xlu1 %441  ;;  %1591 = vrsqrt.f32 %v2290_v63 }
 0x147   : > { %v2311_v34 = vpop.xlane.xlu0 %439  ;;  %v634_v48 = vmul.f32 %v1578_v14, %v2260_v60  ;;  %1593 = vrcp.f32 %v732_v62  ;;  %v733_v35 = vadd.f32 1e-06, %v479_v18  ;;  %v659_v62 = vand.u32 2147483648, %v2288_v61 }
 0x148   : > { %v643_v49 = vsel %vm642_vm12, %v2258_v57, %v641_v28  ;;  %1595 = vrcp.f32 %v734_v15  ;;  %v492_v57 = vand.u32 2147483648, %v2274_v25  ;;  %vm651_vm7 = vcmp.eq.f32.partialorder %v2290_v63, 0.0 }
 0x149   : > { %v1580_v38 = vpop.eup %1579  ;;  %v646_v39 = vsel %vm644_vm13, %v645_v50, %v643_v49  ;;  %v636_v40 = vsel %vm635_vm14, %v2260_v60, %v634_v48  ;;  %1597 = vrsqrt.f32 %v2309_v33  ;;  %v652_v13 = vand.u32 2147483648, %v2290_v63 }
 0x14a   : > { %v782_v43 = vadd.f32 1e-06, %v646_v39  ;;  %v639_v51 = vsel %vm637_vm15, %v638_v6, %v636_v40  ;;  %v495_v54 = vmul.f32 %v1580_v38, %v2272_v24  ;;  %v2331_v55 = vpop.xlane.xlu1 %601  ;;  %1599 = vrsqrt.f32 %v2311_v34  ;;  %v1582_v50 = vpop.eup %1581 }
 0x14b   : > { %v2333_v56 = vpop.xlane.xlu0 %599  ;;  %1601 = vrcp.f32 %v733_v35  ;;  %v781_v60 = vadd.f32 1e-06, %v639_v51  ;;  %v2343_v45 = vpop.eup %1583  ;;  %v488_v7 = vmul.f32 %v1582_v50, %v2274_v25  ;;  %vm510_vm8 = vcmp.eq.f32.partialorder %v2309_v33, inf }
 0x14c   : > { %v497_v44 = vsel %vm496_vm0, %v2272_v24, %v495_v54  ;;  %1603 = vrcp.f32 %v782_v43  ;;  %v2349_v8 = vpop.eup %1585  ;;  %vm512_vm9 = vcmp.eq.f32.partialorder %v2309_v33, 0.0  ;;  %v513_v35 = vand.u32 2147483648, %v2309_v33 }
 0x14d   : > { %v500_v6 = vsel %vm498_vm1, %v499_v23, %v497_v44  ;;  %1605 = vrsqrt.f32 %v2331_v55  ;;  %v490_v28 = vsel %vm489_vm2, %v2274_v25, %v488_v7  ;;  %vm503_vm10 = vcmp.eq.f32.partialorder %v2311_v34, inf }
 0x14e   : > { %v2355_v14 = vpop.xlane.xlu1 %445  ;;  %v2359_v24 = vpop.eup %1587  ;;  %v736_v18 = vadd.f32 1e-06, %v500_v6  ;;  %1607 = vrsqrt.f32 %v2333_v56  ;;  %v493_v23 = vsel %vm491_vm3, %v492_v57, %v490_v28  ;;  %vm505_vm11 = vcmp.eq.f32.partialorder %v2311_v34, 0.0 }
 0x14f   : > { %v2357_v15 = vpop.xlane.xlu0 %443  ;;  %v1590_v48 = vpop.eup %1589  ;;  %1609 = vrcp.f32 %v781_v60  ;;  %v506_v39 = vand.u32 2147483648, %v2311_v34  ;;  %vm670_vm12 = vcmp.eq.f32.partialorder %v2331_v55, inf  ;;  %v673_v25 = vand.u32 2147483648, %v2331_v55 }
 0x150   : > { %v1592_v49 = vpop.eup %1591  ;;  %v655_v38 = vmul.f32 %v1590_v48, %v2288_v61  ;;  %1611 = vrsqrt.f32 %v2355_v14  ;;  %v735_v50 = vadd.f32 1e-06, %v493_v23  ;;  %vm672_vm13 = vcmp.eq.f32.partialorder %v2331_v55, 0.0 }
 0x151   : > { %v1594_v40 = vpop.eup %1593  ;;  %v648_v43 = vmul.f32 %v1592_v49, %v2290_v63  ;;  %1613 = vrsqrt.f32 %v2357_v15  ;;  %vm663_vm14 = vcmp.eq.f32.partialorder %v2333_v56, inf  ;;  %vm665_vm15 = vcmp.eq.f32.partialorder %v2333_v56, 0.0 }
 0x152   : > { %v2378_v51 = vpop.xlane.xlu1 %605  ;;  %v2382_v57 = vpop.eup %1595  ;;  %1615 = vrcp.f32 %v736_v18  ;;  %v657_v60 = vsel %vm656_vm4, %v2288_v61, %v655_v38  ;;  %v666_v18 = vand.u32 2147483648, %v2333_v56  ;;  %vm524_vm0 = vcmp.eq.f32.partialorder %v2355_v14, inf }
 0x153   : > { %v2380_v54 = vpop.xlane.xlu0 %603  ;;  %v1598_v44 = vpop.eup %1597  ;;  %v660_v6 = vsel %vm658_vm5, %v659_v62, %v657_v60  ;;  %v650_v7 = vsel %vm649_vm6, %v2290_v63, %v648_v43  ;;  %1617 = vrsqrt.f32 %v2378_v51  ;;  %vm526_vm1 = vcmp.eq.f32.partialorder %v2355_v14, 0.0 }
 0x154   : > { %v1600_v28 = vpop.eup %1599  ;;  %v784_v48 = vadd.f32 1e-06, %v660_v6  ;;  %v653_v23 = vsel %vm651_vm7, %v652_v13, %v650_v7  ;;  %v509_v49 = vmul.f32 %v1598_v44, %v2309_v33  ;;  %v527_v43 = vand.u32 2147483648, %v2355_v14 }
 0x155   : > { %v2401_v61 = vpop.eup %1601  ;;  %v783_v62 = vadd.f32 1e-06, %v653_v23  ;;  %v502_v38 = vmul.f32 %v1600_v28, %v2311_v34  ;;  %1619 = vrcp.f32 %v735_v50  ;;  %vm517_vm2 = vcmp.eq.f32.partialorder %v2357_v15, inf }
 0x156   : > { %v2406_v60 = vpop.xlane.xlu1 %449  ;;  %v2408_v30 = vpop.eup %1603  ;;  %v511_v63 = vsel %vm510_vm8, %v2309_v33, %v509_v49  ;;  %vm519_vm3 = vcmp.eq.f32.partialorder %v2357_v15, 0.0  ;;  %1621 = vrcp.f32 %v784_v48  ;;  %v520_v50 = vand.u32 2147483648, %v2357_v15 }
 0x157   : > { %v2415_v13 = vpop.xlane.xlu0 %447  ;;  %v1606_v44 = vpop.eup %1605  ;;  %v514_v6 = vsel %vm512_vm9, %v513_v35, %v511_v63  ;;  %v504_v7 = vsel %vm503_vm10, %v2311_v34, %v502_v38  ;;  %vm684_vm4 = vcmp.eq.f32.partialorder %v2378_v51, inf  ;;  %1623 = vrsqrt.f32 %v2380_v54 }
 0x158   : > { %v1608_v28 = vpop.eup %1607  ;;  %v507_v23 = vsel %vm505_vm11, %v506_v39, %v504_v7  ;;  %v669_v49 = vmul.f32 %v1606_v44, %v2331_v55  ;;  %1625 = vrcp.f32 %v783_v62  ;;  %v763_v35 = vmul.f32 %v2349_v8, %v2112_v3 }
 0x159   : > { %v2428_v48 = vpop.eup %1609  ;;  %v662_v33 = vmul.f32 %v1608_v28, %v2333_v56  ;;  %v764_v38 = vmul.f32 %v1594_v40, %v2116_v5  ;;  %v738_v20 = vadd.f32 1e-06, %v514_v6  ;;  %v811_v39 = vmul.f32 %v2343_v45, %v2110_v2 }
 0x15a   : > { %v1612_v63 = vpop.eup %1611  ;;  %v671_v34 = vsel %vm670_vm12, %v2331_v55, %v669_v49  ;;  %v812_v44 = vmul.f32 %v2359_v24, %v2114_v4  ;;  %v2441_v62 = vpop.xlane.xlu1 %609  ;;  %v737_v28 = vadd.f32 1e-06, %v507_v23  ;;  %1627 = vrsqrt.f32 %v2406_v60 }
 0x15b   : > { %v1614_v7 = vpop.eup %1613  ;;  %v674_v3 = vsel %vm672_vm13, %v673_v25, %v671_v34  ;;  %v664_v5 = vsel %vm663_vm14, %v2333_v56, %v662_v33  ;;  %v523_v8 = vmul.f32 %v1612_v63, %v2355_v14  ;;  %v827_v45 = vmul.f32 %v811_v39, %v763_v35  ;;  %v2454_v24 = vpop.xlane.xlu0 %607 }
 0x15c   : > { %v2449_v40 = vpop.eup %1615  ;;  %v786_v6 = vadd.f32 1e-06, %v674_v3  ;;  %v667_v2 = vsel %vm665_vm15, %v666_v18, %v664_v5  ;;  %v516_v4 = vmul.f32 %v1614_v7, %v2357_v15  ;;  %v828_v49 = vmul.f32 %v812_v44, %v764_v38 }
 0x15d   : > { %v1618_v23 = vpop.eup %1617  ;;  %v785_v55 = vadd.f32 1e-06, %v667_v2  ;;  %v525_v25 = vsel %vm524_vm0, %v2355_v14, %v523_v8  ;;  %1629 = vrcp.f32 %v738_v20  ;;  %v687_v14 = vand.u32 2147483648, %v2378_v51 }
 0x15e   : > { %v528_v33 = vsel %vm526_vm1, %v527_v43, %v525_v25  ;;  %v518_v56 = vsel %vm517_vm2, %v2357_v15, %v516_v4  ;;  %v683_v18 = vmul.f32 %v1618_v23, %v2378_v51  ;;  %1631 = vrcp.f32 %v737_v28  ;;  %v2474_v43 = vpop.xlane.xlu1 %453 }
 0x15f   : > { %v740_v35 = vadd.f32 1e-06, %v528_v33  ;;  %v521_v63 = vsel %vm519_vm3, %v520_v50, %v518_v56  ;;  %v843_v34 = vpack.c.bf16 %v828_v49, %v827_v45  ;;  %v2468_v39 = vpop.eup %1619  ;;  %1633 = vrcp.f32 %v786_v6  ;;  %v2479_v7 = vpop.xlane.xlu0 %451 }
 0x160   : > { %v739_v38 = vadd.f32 1e-06, %v521_v63  ;;  %v685_v20 = vsel %vm684_vm4, %v2378_v51, %v683_v18  ;;  %v2476_v44 = vpop.eup %1621  ;;  %1635 = vrcp.f32 %v785_v55  ;;  %vm686_vm5 = vcmp.eq.f32.partialorder %v2378_v51, 0.0 }
 0x161   : > { %1419 = vmatprep.mubr.bf16.mxu0 %v843_v34  ;;  %v1624_v15 = vpop.eup %1623  ;;  %1637 = vrcp.f32 %v740_v35  ;;  %v688_v50 = vsel %vm686_vm5, %v687_v14, %v685_v20  ;;  %vm677_vm6 = vcmp.eq.f32.partialorder %v2380_v54, inf  ;;  %vm679_vm7 = vcmp.eq.f32.partialorder %v2380_v54, 0.0 }
 0x162   : > { %v1626_v28 = vpop.eup %1625  ;;  %v676_v3 = vmul.f32 %v1624_v15, %v2380_v54  ;;  %1639 = vrsqrt.f32 %v2415_v13  ;;  %v680_v5 = vand.u32 2147483648, %v2380_v54  ;;  %vm538_vm8 = vcmp.eq.f32.partialorder %v2406_v60, inf  ;;  %v2496_v23 = vpop.xlane.xlu1 %613 }
 0x163   : > { %1641 = vrcp.f32 %v739_v38  ;;  %vm540_vm9 = vcmp.eq.f32.partialorder %v2406_v60, 0.0  ;;  %v788_v51 = vadd.f32 1e-06, %v688_v50  ;;  %v541_v6 = vand.u32 2147483648, %v2406_v60 }
 0x164   : > { %v678_v8 = vsel %vm677_vm6, %v2380_v54, %v676_v3  ;;  %1643 = vrsqrt.f32 %v2441_v62  ;;  %v765_v4 = vmul.f32 %v2401_v61, %v2129_v12  ;;  %v813_v45 = vmul.f32 %v2428_v48, %v2138_v17  ;;  %v1628_v55 = vpop.eup %1627  ;;  %v2509_v48 = vpop.xlane.xlu0 %611 }
 0x165   : > { %v681_v2 = vsel %vm679_vm7, %v680_v5, %v678_v8  ;;  %1645 = vrsqrt.f32 %v2454_v24  ;;  %vm531_vm10 = vcmp.eq.f32.partialorder %v2415_v13, inf  ;;  %v766_v54 = vmul.f32 %v2382_v57, %v2127_v11 }
 0x166   : > { %v814_v25 = vmul.f32 %v2408_v30, %v2136_v16  ;;  %1647 = vrsqrt.f32 %v2474_v43  ;;  %v537_v12 = vmul.f32 %v1628_v55, %v2406_v60  ;;  %vm533_vm11 = vcmp.eq.f32.partialorder %v2415_v13, 0.0  ;;  %v2535_v20 = vpop.xlane.xlu1 %457 }
 0x167   : > { %v2504_v49 = vpop.eup %1629  ;;  %v534_v17 = vand.u32 2147483648, %v2415_v13  ;;  %v829_v61 = vmul.f32 %v813_v45, %v765_v4  ;;  %1649 = vrcp.f32 %v788_v51  ;;  %v787_v11 = vadd.f32 1e-06, %v681_v2 }
 0x168   : > { %v2511_v33 = vpop.eup %1631  ;;  %vm698_vm12 = vcmp.eq.f32.partialorder %v2441_v62, inf  ;;  %v830_v16 = vmul.f32 %v814_v25, %v766_v54  ;;  %v539_v57 = vsel %vm538_vm8, %v2406_v60, %v537_v12  ;;  %vm700_vm13 = vcmp.eq.f32.partialorder %v2441_v62, 0.0  ;;  %v2550_v2 = vpop.xlane.xlu0 %455 }
 0x169   : > { %v2514_v30 = vpop.eup %1633  ;;  %v701_v56 = vand.u32 2147483648, %v2441_v62  ;;  %vm691_vm14 = vcmp.eq.f32.partialorder %v2454_v24, inf  ;;  %1651 = vrsqrt.f32 %v2479_v7  ;;  %vm693_vm15 = vcmp.eq.f32.partialorder %v2454_v24, 0.0 }
 0x16a   : > { %v2523_v18 = vpop.eup %1635  ;;  %v694_v35 = vand.u32 2147483648, %v2454_v24  ;;  %v844_v63 = vpack.c.bf16 %v830_v16, %v829_v61  ;;  %1653 = vrsqrt.f32 %v2496_v23  ;;  %v542_v38 = vsel %vm540_vm9, %v541_v6, %v539_v57 }
 0x16b   : > { %v2528_v34 = vpop.eup %1637  ;;  %vm552_vm0 = vcmp.eq.f32.partialorder %v2474_v43, inf  ;;  %vm554_vm1 = vcmp.eq.f32.partialorder %v2474_v43, 0.0  ;;  %1655 = vrsqrt.f32 %v2509_v48  ;;  %v555_v15 = vand.u32 2147483648, %v2474_v43 }
 0x16c   : > { %v1640_v14 = vpop.eup %1639  ;;  %1657 = vrcp.f32 %v787_v11  ;;  %1420 = vmatmul.mubr.bf16.vlgmr.msra.gmra.mrb[0].mxu0 %v844_v63  ;;  %v548_v50 = vand.u32 2147483648, %v2479_v7  ;;  %v767_v3 = vmul.f32 %v2468_v39, %v2147_v22  ;;  %vm545_vm2 = vcmp.eq.f32.partialorder %v2479_v7, inf  ;;  %v2571_v11 = vpop.xlane.xlu1 %617 }
 0x16d   : > { %v2541_v60 = vpop.eup %1641  ;;  %v530_v5 = vmul.f32 %v1640_v14, %v2415_v13  ;;  %v768_v51 = vmul.f32 %v2449_v40, %v2145_v21  ;;  %v815_v8 = vmul.f32 %v1626_v28, %v2156_v27  ;;  %v816_v6 = vmul.f32 %v2476_v44, %v2154_v26 }
 0x16e   : > { %v1644_v4 = vpop.eup %1643  ;;  %v742_v45 = vadd.f32 1e-06, %v542_v38  ;;  %vm547_vm3 = vcmp.eq.f32.partialorder %v2479_v7, 0.0  ;;  %vm712_vm4 = vcmp.eq.f32.partialorder %v2496_v23, inf  ;;  %v715_v22 = vand.u32 2147483648, %v2496_v23 }
 0x16f   : > { %1659 = vrsqrt.f32 %v2535_v20  ;;  %v1646_v39 = vpop.eup %1645  ;;  %v532_v21 = vsel %vm531_vm10, %v2415_v13, %v530_v5  ;;  %v697_v27 = vmul.f32 %v1644_v4, %v2441_v62  ;;  %vm714_vm5 = vcmp.eq.f32.partialorder %v2496_v23, 0.0 }
 0x170   : > { %vm705_vm6 = vcmp.eq.f32.partialorder %v2509_v48, inf  ;;  %v831_v26 = vmul.f32 %v815_v8, %v767_v3  ;;  %v832_v40 = vmul.f32 %v816_v6, %v768_v51  ;;  %v1648_v44 = vpop.eup %1647  ;;  %v535_v28 = vsel %vm533_vm11, %v534_v17, %v532_v21 }
 0x171   : > { %v690_v55 = vmul.f32 %v1646_v39, %v2454_v24  ;;  %vm707_vm7 = vcmp.eq.f32.partialorder %v2509_v48, 0.0  ;;  %1661 = vrsqrt.f32 %v2550_v2  ;;  %v741_v54 = vadd.f32 1e-06, %v535_v28  ;;  %v2573_v16 = vpop.eup %1649 }
 0x172   : > { %v699_v25 = vsel %vm698_vm12, %v2441_v62, %v697_v27  ;;  %v551_v12 = vmul.f32 %v1648_v44, %v2474_v43  ;;  %v845_v61 = vpack.c.bf16 %v832_v40, %v831_v26  ;;  %1663 = vrcp.f32 %v742_v45 }
 0x173   : > { %v702_v13 = vsel %vm700_vm13, %v701_v56, %v699_v25  ;;  %v692_v17 = vsel %vm691_vm14, %v2454_v24, %v690_v55  ;;  %v708_v57 = vand.u32 2147483648, %v2509_v48  ;;  %v1652_v63 = vpop.eup %1651  ;;  %1665 = vrcp.f32 %v741_v54 }
 0x174   : > { %v790_v38 = vadd.f32 1e-06, %v702_v13  ;;  %v695_v14 = vsel %vm693_vm15, %v694_v35, %v692_v17  ;;  %v553_v3 = vsel %vm552_vm0, %v2474_v43, %v551_v12  ;;  %1423 = vmatprep.mubr.bf16.mxu0 %v845_v61  ;;  %v1654_v5 = vpop.eup %1653  ;;  %v544_v51 = vmul.f32 %v1652_v63, %v2479_v7  ;;  %v2592_v35 = vpop.xlane.xlu0 %615 }
 0x175   : > { %v789_v62 = vadd.f32 1e-06, %v695_v14  ;;  %v556_v56 = vsel %vm554_vm1, %v555_v15, %v553_v3  ;;  %1667 = vrsqrt.f32 %v2571_v11  ;;  %v1656_v8 = vpop.eup %1655  ;;  %v711_v24 = vmul.f32 %v1654_v5, %v2496_v23 }
 0x176   : > { %1669 = vrcp.f32 %v790_v38  ;;  %v744_v6 = vadd.f32 1e-06, %v556_v56  ;;  %vm566_vm8 = vcmp.eq.f32.partialorder %v2535_v20, inf  ;;  %v1658_v4 = vpop.eup %1657  ;;  %v546_v43 = vsel %vm545_vm2, %v2479_v7, %v544_v51 }
 0x177   : > { %1671 = vrcp.f32 %v789_v62  ;;  %v704_v15 = vmul.f32 %v1656_v8, %v2509_v48  ;;  %vm568_vm9 = vcmp.eq.f32.partialorder %v2535_v20, 0.0  ;;  %v549_v45 = vsel %vm547_vm3, %v548_v50, %v546_v43 }
 0x178   : > { %v713_v39 = vsel %vm712_vm4, %v2496_v23, %v711_v24  ;;  %v569_v21 = vand.u32 2147483648, %v2535_v20  ;;  %vm559_vm10 = vcmp.eq.f32.partialorder %v2550_v2, inf  ;;  %v743_v26 = vadd.f32 1e-06, %v549_v45 }
 0x179   : > { %v1660_v27 = vpop.eup %1659  ;;  %v716_v40 = vsel %vm714_vm5, %v715_v22, %v713_v39  ;;  %v706_v44 = vsel %vm705_vm6, %v2509_v48, %v704_v15  ;;  %1673 = vrsqrt.f32 %v2592_v35  ;;  %vm561_vm11 = vcmp.eq.f32.partialorder %v2550_v2, 0.0 }
 0x17a   : > { %1675 = vrcp.f32 %v744_v6  ;;  %v792_v7 = vadd.f32 1e-06, %v716_v40  ;;  %v709_v50 = vsel %vm707_vm7, %v708_v57, %v706_v44  ;;  %v565_v28 = vmul.f32 %v1660_v27, %v2535_v20 }
 0x17b   : > { %v1662_v55 = vpop.eup %1661  ;;  %1677 = vrcp.f32 %v743_v26  ;;  %v791_v54 = vadd.f32 1e-06, %v709_v50  ;;  %v562_v23 = vand.u32 2147483648, %v2550_v2  ;;  %vm726_vm12 = vcmp.eq.f32.partialorder %v2571_v11, inf }
 0x17c   : > { %1679 = vrcp.f32 %v792_v7  ;;  %v567_v22 = vsel %vm566_vm8, %v2535_v20, %v565_v28  ;;  %v558_v25 = vmul.f32 %v1662_v55, %v2550_v2  ;;  %v1664_v48 = vpop.eup %1663  ;;  %v769_v61 = vmul.f32 %v2511_v33, %v2165_v32 }
 0x17d   : > { %1681 = vrcp.f32 %v791_v54  ;;  %v570_v12 = vsel %vm568_vm9, %v569_v21, %v567_v22  ;;  %v817_v13 = vmul.f32 %v2523_v18, %v2174_v37  ;;  %v1666_v17 = vpop.eup %1665  ;;  %vm728_vm13 = vcmp.eq.f32.partialorder %v2571_v11, 0.0 }
 0x17e   : > { %v560_v57 = vsel %vm559_vm10, %v2550_v2, %v558_v25  ;;  %v770_v63 = vmul.f32 %v2504_v49, %v2163_v31  ;;  %v818_v20 = vmul.f32 %v2514_v30, %v2172_v36  ;;  %v771_v37 = vmul.f32 %v2541_v60, %v2183_v42  ;;  %v2779_v25 = vld [vmem:[#allocation14_spill] sm:$0xff] }
 0x17f   : > { %v1668_v38 = vpop.eup %1667  ;;  %v563_v32 = vsel %vm561_vm11, %v562_v23, %v560_v57  ;;  %v833_v33 = vmul.f32 %v817_v13, %v769_v61  ;;  %v819_v18 = vmul.f32 %v1658_v4, %v2192_v47  ;;  %v746_v3 = vadd.f32 1e-06, %v570_v12  ;;  %v2780_v12 = vld [vmem:[#allocation15_spill] sm:$0xff] }
 0x180   : > { %v1670_v14 = vpop.eup %1669  ;;  %v725_v5 = vmul.f32 %v1668_v38, %v2571_v11  ;;  %v729_v62 = vand.u32 2147483648, %v2571_v11  ;;  %v834_v31 = vmul.f32 %v818_v20, %v770_v63  ;;  %v745_v56 = vadd.f32 1e-06, %v563_v32 }
 0x181   : > { %v1672_v49 = vpop.eup %1671  ;;  %v772_v36 = vmul.f32 %v2528_v34, %v2181_v41  ;;  %v820_v30 = vmul.f32 %v2573_v16, %v2190_v46  ;;  %v835_v2 = vmul.f32 %v819_v18, %v771_v37  ;;  %v773_v60 = vmul.f32 %v1666_v17, %v2201_v53 }
 0x182   : > { %v727_v42 = vsel %vm726_vm12, %v2571_v11, %v725_v5  ;;  %v846_v47 = vpack.c.bf16 %v834_v31, %v833_v33  ;;  %v821_v51 = vmul.f32 %v1672_v49, %v2210_v59  ;;  %v774_v41 = vmul.f32 %v1664_v48, %v2199_v52 }
 0x183   : > { %v1674_v8 = vpop.eup %1673  ;;  %v730_v6 = vsel %vm728_vm13, %v729_v62, %v727_v42  ;;  %v836_v24 = vmul.f32 %v820_v30, %v772_v36  ;;  %v822_v34 = vmul.f32 %v1670_v14, %v2208_v58  ;;  %vm719_vm14 = vcmp.eq.f32.partialorder %v2592_v35, inf }
 0x184   : > { %v1676_v46 = vpop.eup %1675  ;;  %v794_v16 = vadd.f32 1e-06, %v730_v6  ;;  %v718_v4 = vmul.f32 %v1674_v8, %v2592_v35  ;;  %1424 = vmatmul.mubr.bf16.gmra.mrb[4].mxu0 %v846_v47  ;;  %v837_v43 = vmul.f32 %v821_v51, %v773_v60  ;;  %1683 = vrcp.f32 %v746_v3 }
 0x185   : > { %v1678_v53 = vpop.eup %1677  ;;  %v722_v59 = vand.u32 2147483648, %v2592_v35  ;;  %v847_v15 = vpack.c.bf16 %v836_v24, %v835_v2  ;;  %v838_v11 = vmul.f32 %v822_v34, %v774_v41  ;;  %vm721_vm15 = vcmp.eq.f32.partialorder %v2592_v35, 0.0 }
 0x186   : > { %v1680_v45 = vpop.eup %1679  ;;  %1685 = vrcp.f32 %v794_v16  ;;  %v720_v52 = vsel %vm719_vm14, %v2592_v35, %v718_v4  ;;  %v776_v21 = vmul.f32 %v1676_v46, %v2217_v0  ;;  %v775_v44 = vmul.f32 %v1678_v53, %v2219_v1 }
 0x187   : > { %v1682_v58 = vpop.eup %1681  ;;  %1687 = vrcp.f32 %v745_v56  ;;  %v723_v39 = vsel %vm721_vm15, %v722_v59, %v720_v52  ;;  %1427 = vmatprep.mubr.bf16.mxu0 %v847_v15  ;;  %v824_v27 = vmul.f32 %v1680_v45, %v2226_v9  ;;  %v848_v40 = vpack.c.bf16 %v838_v11, %v837_v43 }
 0x188   : > { %v793_v26 = vadd.f32 1e-06, %v723_v39  ;;  %v823_v7 = vmul.f32 %v1682_v58, %v2228_v10  ;;  %v1862_v17 = vmov 0.0|0.0   ;;  %vm1863_vm0 = vmmov 0  }
 0x189   : > { %v840_v50 = vmul.f32 %v824_v27, %v776_v21  ;;  %1470 = vmatprep.subr.bf16.mxu1 %v1862_v17  ;;  %v1864_v57 = vmov 0.0  }
 0x18a   : > { %1689 = vrcp.f32 %v793_v26  ;;  %v839_v28 = vmul.f32 %v823_v7, %v775_v44  ;;  %1467 = vmatprep.mubr.msk.f32.mxu1 %vm1863_vm0, %v1864_v57 }
 0x18c   : > { %1428 = vmatmul.mubr.bf16.gmra.mrb[8].mxu0 %v848_v40  ;;  %v849_v55 = vpack.c.bf16 %v840_v50, %v839_v28 }
 0x18e   : > { %1431 = vmatprep.mubr.bf16.mxu0 %v849_v55  ;;  %v1684_v35 = vpop.eup %1683 }
 0x18f   : > { %v778_v0 = vmul.f32 %v1684_v35, %v2235_v19 }
 0x190   : > { %v1686_v54 = vpop.eup %1685 }
 0x191   : > { %v1688_v23 = vpop.eup %1687  ;;  %v826_v22 = vmul.f32 %v1686_v54, %v2244_v29  ;;  %v2673_v29 = vld [vmem:[%s2753_s3] ss:$0 sm:$0xff] }
 0x192   : > { %v777_v48 = vmul.f32 %v1688_v23, %v2779_v25 }
 0x193   : > { %v842_v61 = vmul.f32 %v826_v22, %v778_v0 }
 0x194   : > { %v1690_v9 = vpop.eup %1689 }
 0x195   : > { %v825_v1 = vmul.f32 %v1690_v9, %v2780_v12 }
 0x197   : > { %v841_v10 = vmul.f32 %v825_v1, %v777_v48 }
 0x199   : > { %v850_v13 = vpack.c.bf16 %v842_v61, %v841_v10 }
 0x19b   : > { %1432 = vmatmul.mubr.bf16.gmra.mrb[12].mxu0 %v850_v13 }
 0x23f   : > { %v1421_v19 = vpop.f32.mrb[0].mxu0 }
 0x240   : > { %v965_v63 = vadd.f32 %v1421_v19, %v2673_v29  ;;  %v956_v20 = vpop.f32.mrb[1].mxu0 }
 0x241   : > { %v957_v38 = vadd.f32 %v2673_v29, %v956_v20  ;;  %v1422_v32 = vpop.f32.mrb[2].mxu0 }
 0x242   : > { %v1037_v33 = vmul.f32 0.01, %v965_v63  ;;  %v968_v37 = vadd.f32 %v1422_v32, %v2673_v29  ;;  %v959_v18 = vpop.f32.mrb[3].mxu0  ;;  %vm1021_vm1 = vcmp.gt.f32.partialorder %v965_v63, 0.0 }
 0x243   : > { %v1035_v14 = vmul.f32 0.01, %v957_v38  ;;  %v960_v3 = vadd.f32 %v2673_v29, %v959_v18  ;;  %vm1019_vm3 = vcmp.gt.f32.partialorder %v957_v38, 0.0 }
 0x244   : > { %vm1022_vm2 = vcmp.gt.f32.partialorder %v968_v37, 0.0  ;;  %v1038_v5 = vmul.f32 0.01, %v968_v37  ;;  %v1053_v31 = vsel %vm1021_vm1, %v965_v63, %v1037_v33 }
 0x245   : > { %v1036_v62 = vmul.f32 0.01, %v960_v3  ;;  %vm1020_vm4 = vcmp.gt.f32.partialorder %v960_v3, 0.0  ;;  %v1051_v56 = vsel %vm1019_vm3, %v957_v38, %v1035_v14 }
 0x246   : > { %v1054_v49 = vsel %vm1022_vm2, %v968_v37, %v1038_v5  ;;  %v1069_v5 = vstv %s1068_s18 }
 0x247   : > { %v1052_v36 = vsel %vm1020_vm4, %v960_v3, %v1036_v62  ;;  %v1474_v30 = vpack.c.bf16 %v1054_v49, %v1053_v31 }
 0x248   : > { %v1471_v2 = vpack.c.bf16 %v1052_v36, %v1051_v56 }
 0x24a   : > { %1472 = vmatpush3.bf16.xpose.msra.mxu1 %v1471_v2 }
 0x24b   : > { %1473 = vmatprep.subr.bf16.mxu1 %v1862_v17 }
 0x252   : > { %1475 = vmatpush3.bf16.xpose.msra.mxu1 %v1474_v30 }
 0x253   : > { %1476 = vmatprep.subr.bf16.mxu1 %v1862_v17 }
 0x257   : > { %v1425_v42 = vpop.f32.mrb[4].mxu0 }
 0x258   : > { %v981_v47 = vadd.f32 %v1425_v42, %v2673_v29  ;;  %v972_v60 = vpop.f32.mrb[5].mxu0 }
 0x259   : > { %v973_v51 = vadd.f32 %v2673_v29, %v972_v60  ;;  %v1426_v8 = vpop.f32.mrb[6].mxu0 }
 0x25a   : > { %v1041_v6 = vmul.f32 0.01, %v981_v47  ;;  %v984_v24 = vadd.f32 %v1426_v8, %v2673_v29  ;;  %v975_v41 = vpop.f32.mrb[7].mxu0  ;;  %vm1025_vm5 = vcmp.gt.f32.partialorder %v981_v47, 0.0 }
 0x25b   : > { %v1039_v34 = vmul.f32 0.01, %v973_v51  ;;  %v976_v46 = vadd.f32 %v2673_v29, %v975_v41  ;;  %vm1023_vm6 = vcmp.gt.f32.partialorder %v973_v51, 0.0 }
 0x25c   : > { %vm1026_vm7 = vcmp.gt.f32.partialorder %v984_v24, 0.0  ;;  %v1042_v16 = vmul.f32 0.01, %v984_v24  ;;  %v1057_v43 = vsel %vm1025_vm5, %v981_v47, %v1041_v6 }
 0x25d   : > { %vm1024_vm8 = vcmp.gt.f32.partialorder %v976_v46, 0.0  ;;  %v1040_v4 = vmul.f32 0.01, %v976_v46  ;;  %v1055_v59 = vsel %vm1023_vm6, %v973_v51, %v1039_v34 }
 0x25e   : > { %v1058_v53 = vsel %vm1026_vm7, %v984_v24, %v1042_v16 }
 0x25f   : > { %v1056_v15 = vsel %vm1024_vm8, %v976_v46, %v1040_v4  ;;  %v1429_v11 = vpop.f32.mrb[8].mxu0  ;;  %v1480_v45 = vpack.c.bf16 %v1058_v53, %v1057_v43 }
 0x260   : > { %v1477_v52 = vpack.c.bf16 %v1056_v15, %v1055_v59  ;;  %v997_v58 = vadd.f32 %v1429_v11, %v2673_v29  ;;  %v988_v39 = vpop.f32.mrb[9].mxu0 }
 0x261   : > { %v989_v21 = vadd.f32 %v2673_v29, %v988_v39  ;;  %v1430_v27 = vpop.f32.mrb[10].mxu0 }
 0x262   : > { %1478 = vmatpush3.bf16.xpose.msra.mxu1 %v1477_v52  ;;  %v1045_v26 = vmul.f32 0.01, %v997_v58  ;;  %v1000_v40 = vadd.f32 %v1430_v27, %v2673_v29  ;;  %v991_v44 = vpop.f32.mrb[11].mxu0  ;;  %vm1029_vm9 = vcmp.gt.f32.partialorder %v997_v58, 0.0 }
 0x263   : > { %v1043_v7 = vmul.f32 0.01, %v989_v21  ;;  %1479 = vmatprep.subr.bf16.mxu1 %v1862_v17  ;;  %v992_v50 = vadd.f32 %v2673_v29, %v991_v44  ;;  %vm1027_vm10 = vcmp.gt.f32.partialorder %v989_v21, 0.0 }
 0x264   : > { %vm1030_vm11 = vcmp.gt.f32.partialorder %v1000_v40, 0.0  ;;  %v1046_v28 = vmul.f32 0.01, %v1000_v40  ;;  %v1061_v35 = vsel %vm1029_vm9, %v997_v58, %v1045_v26 }
 0x265   : > { %vm1028_vm12 = vcmp.gt.f32.partialorder %v992_v50, 0.0  ;;  %v1044_v55 = vmul.f32 0.01, %v992_v50  ;;  %v1059_v23 = vsel %vm1027_vm10, %v989_v21, %v1043_v7 }
 0x266   : > { %v1062_v54 = vsel %vm1030_vm11, %v1000_v40, %v1046_v28 }
 0x267   : > { %v1060_v22 = vsel %vm1028_vm12, %v992_v50, %v1044_v55  ;;  %v1486_v0 = vpack.c.bf16 %v1062_v54, %v1061_v35 }
 0x268   : > { %v1483_v9 = vpack.c.bf16 %v1060_v22, %v1059_v23 }
 0x26a   : > { %1481 = vmatpush3.bf16.xpose.msra.mxu1 %v1480_v45 }
 0x26b   : > { %1482 = vmatprep.subr.bf16.mxu1 %v1862_v17 }
 0x26e   : > { %v1433_v25 = vpop.f32.mrb[12].mxu0 }
 0x26f   : > { %v1013_v48 = vadd.f32 %v1433_v25, %v2673_v29  ;;  %v1004_v12 = vpop.f32.mrb[13].mxu0 }
 0x270   : > { %v1005_v1 = vadd.f32 %v2673_v29, %v1004_v12  ;;  %v1434_v61 = vpop.f32.mrb[14].mxu0 }
 0x271   : > { %v1049_v10 = vmul.f32 0.01, %v1013_v48  ;;  %v1016_v13 = vadd.f32 %v1434_v61, %v2673_v29  ;;  %v1007_v57 = vpop.f32.mrb[15].mxu0  ;;  %vm1033_vm13 = vcmp.gt.f32.partialorder %v1013_v48, 0.0 }
 0x272   : > { %1484 = vmatpush3.bf16.xpose.msra.mxu1 %v1483_v9  ;;  %v1047_v19 = vmul.f32 0.01, %v1005_v1  ;;  %v1008_v63 = vadd.f32 %v2673_v29, %v1007_v57  ;;  %vm1031_vm14 = vcmp.gt.f32.partialorder %v1005_v1, 0.0  ;;  %v1067_v29 = vld [vmem:[%s2754_s4] sm:$0x1] }
 0x273   : > { %vm1034_vm15 = vcmp.gt.f32.partialorder %v1016_v13, 0.0  ;;  %v1050_v20 = vmul.f32 0.01, %v1016_v13  ;;  %1485 = vmatprep.subr.bf16.mxu1 %v1862_v17  ;;  %v1065_v32 = vsel %vm1033_vm13, %v1013_v48, %v1049_v10 }
 0x274   : > { %vm1032_vm0 = vcmp.gt.f32.partialorder %v1008_v63, 0.0  ;;  %v1048_v38 = vmul.f32 0.01, %v1008_v63  ;;  %v1063_v37 = vsel %vm1031_vm14, %v1005_v1, %v1047_v19 }
 0x275   : > { %v1066_v33 = vsel %vm1034_vm15, %v1016_v13, %v1050_v20 }
 0x276   : > { %v1064_v18 = vsel %vm1032_vm0, %v1008_v63, %v1048_v38  ;;  %v1492_v14 = vpack.c.bf16 %v1066_v33, %v1065_v32 }
 0x277   : > { %v1489_v3 = vpack.c.bf16 %v1064_v18, %v1063_v37 }
 0x27a   : > { %1487 = vmatpush3.bf16.xpose.msra.mxu1 %v1486_v0 }
 0x27b   : > { %1488 = vmatprep.subr.bf16.mxu1 %v1862_v17 }
 0x282   : > { %1490 = vmatpush3.bf16.xpose.msra.mxu1 %v1489_v3 }
 0x283   : > { %1491 = vmatprep.subr.bf16.mxu1 %v1862_v17 }
 0x28a   : > { %1493 = vmatpush3.bf16.xpose.msra.mxu1 %v1492_v14 }
 0x291   : > { %1468 = vmatmul.mubr.f32.vlgmr.msra.gmra.mrb[0].mxu1 %v1067_v29 }
 0x364   : > { %v1136_v62 = vpop.f32.mrb[0].mxu1 }
 0x365   : > { %v1137_v31 = vadd.f32 %v1136_v62, %v1069_v5  ;;  %v1469_v49 = vpop.f32.mrb[1].mxu1 }
 0x367   : > { %v1140_v56 = vmul.f32 0.5, %v1137_v31 }
 0x369   : > { %1691 = vtanh.f32 %v1140_v56 }
 0x373   : > { %v1692_v36 = vpop.eup %1691 }
 0x374   : > { %v1142_v17 = vadd.f32 1.0, %v1692_v36 }
 0x376   : > { %v1143_v30 = vmul.f32 0.5, %v1142_v17 }
 0x378   : > { %1144 = vst [vmem:[%s335_s8] sm:$0x1] %v1143_v30 }
 0x379   : > { %1790 = shalt.err (!%p1787_p1)
}
 0x37a   : > { %s1791_s20 = scalar_lea.hbm %s2706_s14, 16  ;;  %s1795_s16 = scalar_lea.hbm %s2756_s6, 32 }
 0x37b   : > { %p1792_p4 = scmp.ne.s32.totalorder %s2706_s14, %s1791_s20  ;;  %p1796_p6 = scmp.lt.u32.totalorder %s2706_s14, %s2756_s6 }
 0x37c   : > { %p1797_p11 = scmp.lt.u32.totalorder %s1795_s16, %s1791_s20  ;;  %p1799_p3 = scmp.lt.u32.totalorder %s1791_s20, %s2706_s14 }
 0x37d   : > { %p1793_p10 = pnand %p1792_p4, %p2781_p2 }
 0x37e   : > { %p1798_p12 = por %p1797_p11, %p1796_p6 }
 0x37f   : > { %p1794_p5 = pneg %p1793_p10 }
 0x380   : > { %p1800_p13 = por %p1799_p3, %p1798_p12 }
 0x382   : > { %p1801_p7 = pnand %p1800_p13, %p1794_p5 }
 0x384   : > { %1804 = shalt.err (!%p1801_p7)
}
 0x385   : > { %1500 = dma.vmem_to_hbm [thread:$0]  (%p2781_p2), %s2708_s21, 16, %s2706_s14, %s1146_s29  }
 0x386 PF: > { %s1170_s18 = sand.u32 1, %s1839_s23   ;;  %p2782_p8 = scmp.ne.s32.totalorder %s2767_s11, 0 }
 0x387   : > { %s1171_s15 = scalar_lea.sflag [#allocation5], %s1170_s18 }
 0x388   : > { %p1507_p9 = pnand %p1259_p0, %p2782_p8 }
 0x38a   : > { %1834 = dma.done.wait (!%p1507_p9), %s1171_s15, 16  }
 0x38b   : > { %1836 = vsyncadd (!%p1507_p9), %s1171_s15, 4294967280  ;;  %p23_p1 = scmp.ge.s32.totalorder %s1929_s28, 4   ;;  %s2783_s23 = smov %s1843_s24 }
 0x38c   : > { %s2784_s24 = smov %s1847_s25  ;;  %s2785_s25 = smov %s1941_s7 }
 0x38d   : > { %s2786_s26 = smov %s1929_s28  ;;  %25 = sbr.rel (!%p23_p1) target bundleno = 10 (0xa), region = 106 }
 0x394   :  { %1175 = vsyncpa [#allocation4], 1 }
 0x395   :  { %1177 = vsyncpa [#allocation4 + $0x1], 1 }
 0x396   :  { %1178 = vsyncpa [#allocation7], 1 }
 0x397   :  { %1180 = vsyncpa [#allocation7 + $0x1], 1 }
 0x398   :  { %1181 = vsyncpa [#allocation5], 1 }
 0x399   :  { %1183 = vsyncpa [#allocation5 + $0x1], 1 }

</bundles_post_ra>
